<compile_context>
chip_gen: v7x
topology: tpu7x:2x2x1
jax: 0.10.0
libtpu: 0.0.40
codegen_flags: <defaults>
</compile_context>

<pallas_src>
import jax
import jax.numpy as jnp
from jax.experimental import pallas as pl
from jax.experimental.pallas import tpu as pltpu

LANE = 128                    # vreg lane width
MIN_BATCH_TILE = 16           # bf16 sublane tile
MAX_BATCH_TILE = 512          # measured streaming sweet spot (>=85% of HBM roofline)
VMEM_BUDGET = 40 * 1024 * 1024   # our own accounting target for block sizing
VMEM_LIMIT = 48 * 1024 * 1024    # scoped limit passed to Mosaic (safe on v5e/v6e/v7x)


def _cdiv(a, b):
    return -(-a // b)


def _round_up(x, m):
    return _cdiv(x, m) * m


def _pick_batch_tile(batch):
    """HBM-bound kernel: large tiles amortize per-grid-step overhead, but keep
    >= 2 batch steps when the batch allows (so the "parallel" axis can shard
    across v7x's two TensorCores) and keep the padded remainder small.
    Tiles are multiples of 16 (bf16 sublane packing)."""
    if batch <= MIN_BATCH_TILE:
        return MIN_BATCH_TILE
    n_tiles = max(2, _cdiv(batch, MAX_BATCH_TILE))
    return min(MAX_BATCH_TILE, _round_up(_cdiv(batch, n_tiles), MIN_BATCH_TILE))


def _pick_k_tile(in_dim, ep, ap, tb, budget_bytes):
    """Choose the D-reduction tile so double-buffered x/W_embed blocks plus the
    f32 accumulator fit the VMEM budget (re-derived for real input dims, e.g.
    84*84*4 ~ 28K, instead of assuming toy shapes). Returns (tk, Dp) with
    tk % 128 == 0 and Dp an exact multiple of tk."""
    dp_min = _round_up(in_dim, LANE)
    # Resident bytes: f32 acc scratch, single-buffered W_q + biases, double-buffered
    # bf16 out tile.
    fixed = tb * ep * 4 + ep * ap * 2 + (ep + ap) * 4 + 2 * tb * ap * 2
    # Per unit of tk, double-buffered: x (worst case f32) + bf16 W_embed.
    per_k = 2 * (tb * 4 + ep * 2)
    tk_max = max(LANE, (budget_bytes - fixed) // per_k // LANE * LANE)
    if dp_min <= tk_max:
        return dp_min, dp_min                    # single reduction step
    n_k = _cdiv(dp_min, tk_max)
    tk = _round_up(_cdiv(dp_min, n_k), LANE)
    return tk, tk * n_k


def _dqn_kernel(x_ref, we_ref, be_ref, wq_ref, bq_ref, q_ref, acc_ref):
    """Grid = (batch tiles [parallel], D tiles [arbitrary, reduction])."""
    k = pl.program_id(1)

    @pl.when(k == 0)
    def _():
        acc_ref[...] = jnp.zeros_like(acc_ref)

    # Cast activations to bf16 in VMEM (no-op if the wrapper already padded+cast).
    x = x_ref[...].astype(jnp.bfloat16)
    acc_ref[...] += jnp.dot(x, we_ref[...], preferred_element_type=jnp.float32)

    @pl.when(k == pl.num_programs(1) - 1)
    def _():
        # f32 bias + ReLU epilogue (v5e VPU has no bf16), then the tiny Q head.
        h = jnp.maximum(acc_ref[...] + be_ref[...], 0.0)
        q = jnp.dot(h.astype(jnp.bfloat16), wq_ref[...],
                    preferred_element_type=jnp.float32) + bq_ref[...]
        q_ref[...] = q.astype(q_ref.dtype)       # lane-dense bf16 store (Ap = 128)


def init_params(key, in_dim, embed_dim, num_actions):
    """f32 params matching PyTorch nn.Linear default init U(-1/sqrt(fan_in), +)."""
    k1, k2, k3, k4 = jax.random.split(key, 4)
    lim_e = 1.0 / jnp.sqrt(jnp.float32(in_dim))
    lim_q = 1.0 / jnp.sqrt(jnp.float32(embed_dim))
    return {
        # stored (in, out) so the kernel computes x @ W (== x @ W_torch.T)
        "we": jax.random.uniform(k1, (in_dim, embed_dim), jnp.float32, -lim_e, lim_e),
        "be": jax.random.uniform(k2, (1, embed_dim), jnp.float32, -lim_e, lim_e),
        "wq": jax.random.uniform(k3, (embed_dim, num_actions), jnp.float32, -lim_q, lim_q),
        "bq": jax.random.uniform(k4, (1, num_actions), jnp.float32, -lim_q, lim_q),
    }


def prepare_params(params, *, max_batch_tile=MAX_BATCH_TILE,
                   vmem_budget_bytes=VMEM_BUDGET):
    """One-time: pick the D-reduction tile, zero-pad D/E/A and store matmul
    weights as bf16. Zero padding keeps padded embed lanes at exactly 0 after
    ReLU and padded q lanes at 0, so slicing the output recovers the exact
    unpadded math."""
    we, be, wq, bq = params["we"], params["be"], params["wq"], params["bq"]
    in_dim, embed_dim = we.shape
    num_actions = wq.shape[1]
    ep, ap = _round_up(embed_dim, LANE), _round_up(num_actions, LANE)
    tk, dp = _pick_k_tile(in_dim, ep, ap, max_batch_tile, vmem_budget_bytes)

    we_p = jnp.zeros((dp, ep), jnp.bfloat16).at[:in_dim, :embed_dim].set(
        we.astype(jnp.bfloat16))
    be_p = jnp.zeros((1, ep), jnp.float32).at[:, :embed_dim].set(be)
    wq_p = jnp.zeros((ep, ap), jnp.bfloat16).at[:embed_dim, :num_actions].set(
        wq.astype(jnp.bfloat16))
    bq_p = jnp.zeros((1, ap), jnp.float32).at[:, :num_actions].set(bq)
    return {"we": we_p, "be": be_p, "wq": wq_p, "bq": bq_p,
            "dims": (in_dim, embed_dim, num_actions), "tk": tk}


def dqn_forward(states, prepared, hidden_states=None, batch_tile=None):
    """Mirrors DQN.forward.

    Args:
        states: (B, H, W, C) float32, channels-last.
        prepared: output of prepare_params (padded bf16 weights, f32 biases).
        hidden_states: passed through unchanged.

    Returns:
        (q_values (B, num_actions) float32, hidden_state)
    """
    we, be, wq, bq = prepared["we"], prepared["be"], prepared["wq"], prepared["bq"]
    in_dim, _, num_actions = prepared["dims"]
    tk = prepared["tk"]
    dp, ep = we.shape
    ap = wq.shape[1]

    batch = states.shape[0]
    tb = batch_tile if batch_tile is not None else _pick_batch_tile(batch)
    assert tb % MIN_BATCH_TILE == 0, "batch_tile must be a multiple of 16"

    # Flattening NHWC is a metadata-only reshape (no HBM copy).
    x = states.reshape(batch, -1)
    assert x.shape[1] == in_dim, "states feature size != embedder input dim"

    if in_dim == dp and batch % tb == 0:
        # Aligned: stream f32 states straight into the kernel, cast in VMEM.
        x_in, bp = x, batch
    else:
        # Pad copy unavoidable -> fuse the bf16 cast into it (halves the bytes
        # written by the pad pass and the bytes the kernel reads back).
        bp = _round_up(batch, tb)
        x_in = jnp.zeros((bp, dp), jnp.bfloat16).at[:batch, :in_dim].set(
            x.astype(jnp.bfloat16))

    n_b, n_k = bp // tb, dp // tk
    const2d = lambda i, k: (0, 0)

    if n_k == 1:
        we_spec = pl.BlockSpec((tk, ep), lambda i, k: (k, 0),
                               pipeline_mode=pl.Buffered(1))
    else:
        we_spec = pl.BlockSpec((tk, ep), lambda i, k: (k, 0))   # streamed over k

    cost = pl.CostEstimate(
        flops=2 * bp * dp * ep + 2 * bp * ep * ap,
        transcendentals=0,
        bytes_accessed=int(x_in.size * x_in.dtype.itemsize
                           + (we.size + wq.size) * 2 + (ep + ap) * 4
                           + bp * ap * 2),
    )

    q_padded = pl.pallas_call(
        _dqn_kernel,
        out_shape=jax.ShapeDtypeStruct((bp, ap), jnp.bfloat16),
        grid=(n_b, n_k),
        in_specs=[
            pl.BlockSpec((tb, tk), lambda i, k: (i, k)),               # activations
            we_spec,                                                   # W_embed
            pl.BlockSpec((1, ep), const2d, pipeline_mode=pl.Buffered(1)),   # b_embed
            pl.BlockSpec((ep, ap), const2d, pipeline_mode=pl.Buffered(1)),  # W_q
            pl.BlockSpec((1, ap), const2d, pipeline_mode=pl.Buffered(1)),   # b_q
        ],
        out_specs=pl.BlockSpec((tb, ap), lambda i, k: (i, 0)),
        scratch_shapes=[pltpu.VMEM((tb, ep), jnp.float32)],            # f32 accumulator
        compiler_params=pltpu.CompilerParams(
            dimension_semantics=("parallel", "arbitrary"),
            vmem_limit_bytes=VMEM_LIMIT,
        ),
        cost_estimate=cost,
    )(x_in, we, be, wq, bq)

    # Tiny epilogue: drop batch/action padding, return f32 q-values (bf16-limited
    # precision — fine for acting; keep an f32 path if Q-values feed a loss).
    return q_padded[:batch, :num_actions].astype(jnp.float32), hidden_states


if __name__ == "__main__":
    # Small shapes consistent with the module: states (B, H, W, C), stacked frames C=4.
    B, H, W, C = 2, 16, 16, 4
    EMBED_DIM = 32
    NUM_ACTIONS = 4

    key = jax.random.PRNGKey(0)
    k_state, k_param = jax.random.split(key)
    states = jax.random.normal(k_state, (B, H, W, C), jnp.float32)

    params = init_params(k_param, H * W * C, EMBED_DIM, NUM_ACTIONS)
    prepared = prepare_params(params)   # pad + bf16-cast once, outside the hot path

    q_values, hidden = dqn_forward(states, prepared, hidden_states=None)
    q_values = jax.block_until_ready(q_values)

    # Pure-JAX reference of the same math (bf16 matmul inputs, f32 accumulation).
    x = states.reshape(B, -1)
    h_ref = jnp.maximum(
        jnp.dot(x.astype(jnp.bfloat16), params["we"].astype(jnp.bfloat16),
                preferred_element_type=jnp.float32) + params["be"], 0.0)
    q_ref = jnp.dot(h_ref.astype(jnp.bfloat16), params["wq"].astype(jnp.bfloat16),
                    preferred_element_type=jnp.float32) + params["bq"]

    assert q_values.shape == (B, NUM_ACTIONS)
    assert hidden is None
    assert jnp.allclose(q_values, q_ref, atol=2e-2, rtol=2e-2), (q_values, q_ref)

    # TODO(synk): the reference StateEmbedder is abstract in the PyTorch module; a
    # linear+relu surrogate is fused here. A conv embedder would need its own kernel.
    print("KERNEL_OK")
</pallas_src>

<mosaic_0001>
module attributes {stable_mosaic.version = 11 : i64} {
  func.func @_dqn_kernel(%arg0: i32, %arg1: i32, %arg2: memref<16x1024xbf16, #tpu.memory_space<vmem>>, %arg3: memref<1024x128xbf16, #tpu.memory_space<vmem>>, %arg4: memref<1x128xf32, #tpu.memory_space<vmem>>, %arg5: memref<128x128xbf16, #tpu.memory_space<vmem>>, %arg6: memref<1x128xf32, #tpu.memory_space<vmem>>, %arg7: memref<16x128xbf16, #tpu.memory_space<vmem>>, %arg8: memref<16x128xf32, #tpu.memory_space<vmem>>) attributes {dimension_semantics = [#tpu.dimension_semantics<parallel>, #tpu.dimension_semantics<arbitrary>], iteration_bounds = array<i64: 1, 1>, scalar_prefetch = 0 : i64, scratch_operands = 1 : i64, tpu.core_type = #tpu.core_type<tc>, window_params = [{transform_indices = @transform_0, window_bounds = array<i64: 16, 1024>}, {pipeline_mode = #tpu.pipeline_mode<synchronous>, transform_indices = @transform_1, window_bounds = array<i64: 1024, 128>}, {pipeline_mode = #tpu.pipeline_mode<synchronous>, transform_indices = @transform_2, window_bounds = array<i64: 1, 128>}, {pipeline_mode = #tpu.pipeline_mode<synchronous>, transform_indices = @transform_3, window_bounds = array<i64: 128, 128>}, {pipeline_mode = #tpu.pipeline_mode<synchronous>, transform_indices = @transform_4, window_bounds = array<i64: 1, 128>}, {transform_indices = @transform_5, window_bounds = array<i64: 16, 128>}]} {
    %c0_i32 = arith.constant 0 : i32
    %0 = arith.cmpi eq, %arg1, %c0_i32 : i32
    %1 = arith.extui %0 : i1 to i32
    %c0_i32_0 = arith.constant 0 : i32
    %2 = arith.cmpi ne, %1, %c0_i32_0 : i32
    scf.if %2 {
      %cst_10 = arith.constant 0.000000e+00 : f32
      %12 = vector.broadcast %cst_10 : f32 to vector<16x128xf32>
      %c0_11 = arith.constant 0 : index
      %c0_12 = arith.constant 0 : index
      %13 = vector.load %arg8[%c0_11, %c0_12] : memref<16x128xf32, #tpu.memory_space<vmem>>, vector<16x128xf32>
      tpu.vector_store %arg8[%c0_11, %c0_12], %12 {strides = array<i32>} : memref<16x128xf32, #tpu.memory_space<vmem>>, vector<16x128xf32>,
    } else {
    }
    %c0 = arith.constant 0 : index
    %c0_1 = arith.constant 0 : index
    %3 = vector.load %arg2[%c0, %c0_1] : memref<16x1024xbf16, #tpu.memory_space<vmem>>, vector<16x1024xbf16>
    %c0_2 = arith.constant 0 : index
    %c0_3 = arith.constant 0 : index
    %4 = vector.load %arg8[%c0_2, %c0_3] : memref<16x128xf32, #tpu.memory_space<vmem>>, vector<16x128xf32>
    %c0_4 = arith.constant 0 : index
    %c0_5 = arith.constant 0 : index
    %5 = vector.load %arg3[%c0_4, %c0_5] : memref<1024x128xbf16, #tpu.memory_space<vmem>>, vector<1024x128xbf16>
    %cst = arith.constant dense<0.000000e+00> : vector<16x128xf32>
    %6 = tpu.matmul %3, %5, %cst {dimension_numbers = #tpu.dot_dimension_numbers<[1], [0], [0], [1], [0, 0, 1, 1], [], []>} : vector<16x1024xbf16>, vector<1024x128xbf16>, vector<16x128xf32> -> vector<16x128xf32>
    %7 = arith.addf %4, %6 : vector<16x128xf32>
    %c0_6 = arith.constant 0 : index
    %c0_7 = arith.constant 0 : index
    %8 = vector.load %arg8[%c0_6, %c0_7] : memref<16x128xf32, #tpu.memory_space<vmem>>, vector<16x128xf32>
    tpu.vector_store %arg8[%c0_6, %c0_7], %7 {strides = array<i32>} : memref<16x128xf32, #tpu.memory_space<vmem>>, vector<16x128xf32>,
    %c0_i32_8 = arith.constant 0 : i32
    %9 = arith.cmpi eq, %arg1, %c0_i32_8 : i32
    %10 = arith.extui %9 : i1 to i32
    %c0_i32_9 = arith.constant 0 : i32
    %11 = arith.cmpi ne, %10, %c0_i32_9 : i32
    scf.if %11 {
      %c0_10 = arith.constant 0 : index
      %c0_11 = arith.constant 0 : index
      %12 = vector.load %arg8[%c0_10, %c0_11] : memref<16x128xf32, #tpu.memory_space<vmem>>, vector<16x128xf32>
      %c0_12 = arith.constant 0 : index
      %c0_13 = arith.constant 0 : index
      %13 = vector.load %arg4[%c0_12, %c0_13] : memref<1x128xf32, #tpu.memory_space<vmem>>, vector<1x128xf32>
      %14 = vector.broadcast %13 : vector<1x128xf32> to vector<16x128xf32>
      %15 = arith.addf %12, %14 : vector<16x128xf32>
      %cst_14 = arith.constant 0.000000e+00 : f32
      %16 = vector.broadcast %cst_14 : f32 to vector<16x128xf32>
      %17 = arith.maximumf %15, %16 : vector<16x128xf32>
      %18 = arith.truncf %17 : vector<16x128xf32> to vector<16x128xbf16>
      %c0_15 = arith.constant 0 : index
      %c0_16 = arith.constant 0 : index
      %19 = vector.load %arg5[%c0_15, %c0_16] : memref<128x128xbf16, #tpu.memory_space<vmem>>, vector<128x128xbf16>
      %cst_17 = arith.constant dense<0.000000e+00> : vector<16x128xf32>
      %20 = tpu.matmul %18, %19, %cst_17 {dimension_numbers = #tpu.dot_dimension_numbers<[1], [0], [0], [1], [0, 0, 1, 1], [], []>} : vector<16x128xbf16>, vector<128x128xbf16>, vector<16x128xf32> -> vector<16x128xf32>
      %c0_18 = arith.constant 0 : index
      %c0_19 = arith.constant 0 : index
      %21 = vector.load %arg6[%c0_18, %c0_19] : memref<1x128xf32, #tpu.memory_space<vmem>>, vector<1x128xf32>
      %22 = vector.broadcast %21 : vector<1x128xf32> to vector<16x128xf32>
      %23 = arith.addf %20, %22 : vector<16x128xf32>
      %24 = arith.truncf %23 : vector<16x128xf32> to vector<16x128xbf16>
      %c0_20 = arith.constant 0 : index
      %c0_21 = arith.constant 0 : index
      %25 = vector.load %arg7[%c0_20, %c0_21] : memref<16x128xbf16, #tpu.memory_space<vmem>>, vector<16x128xbf16>
      tpu.vector_store %arg7[%c0_20, %c0_21], %24 {strides = array<i32>} : memref<16x128xbf16, #tpu.memory_space<vmem>>, vector<16x128xbf16>,
    } else {
    }
    return
  }
  func.func @transform_0(%arg0: i32, %arg1: i32) -> (i32, i32) {
    %c0_i32 = arith.constant 0 : i32
    return %arg0, %arg1 : i32, i32
  }
  func.func @transform_1(%arg0: i32, %arg1: i32) -> (i32, i32) {
    %c0_i32 = arith.constant 0 : i32
    %c0_i32_0 = arith.constant 0 : i32
    return %arg1, %c0_i32 : i32, i32
  }
  func.func @transform_2(%arg0: i32, %arg1: i32) -> (i32, i32) {
    %c0_i32 = arith.constant 0 : i32
    %c0_i32_0 = arith.constant 0 : i32
    %c0_i32_1 = arith.constant 0 : i32
    return %c0_i32, %c0_i32_0 : i32, i32
  }
  func.func @transform_3(%arg0: i32, %arg1: i32) -> (i32, i32) {
    %c0_i32 = arith.constant 0 : i32
    %c0_i32_0 = arith.constant 0 : i32
    %c0_i32_1 = arith.constant 0 : i32
    return %c0_i32, %c0_i32_0 : i32, i32
  }
  func.func @transform_4(%arg0: i32, %arg1: i32) -> (i32, i32) {
    %c0_i32 = arith.constant 0 : i32
    %c0_i32_0 = arith.constant 0 : i32
    %c0_i32_1 = arith.constant 0 : i32
    return %c0_i32, %c0_i32_0 : i32, i32
  }
  func.func @transform_5(%arg0: i32, %arg1: i32) -> (i32, i32) {
    %c0_i32 = arith.constant 0 : i32
    %c0_i32_0 = arith.constant 0 : i32
    return %arg0, %c0_i32 : i32, i32
  }
}

</mosaic_0001>

<bundles_post_ra>
// kernel: tpu_custom_call.1
= control target key start
LH: loop header
LB: loop body
LE: loop exit
PB: predicated region body
PF: predicated region fallthrough
CT: control target
= control target key end

     0   :  { %10 = vsyncpa [#allocation4], 0  ;;  %s1443_s0 = inlined_call_operand.hbm [shape: bf16[16,1024], index: 0, kind: input, shape index: {}]   ;;  %s1444_s1 = inlined_call_operand.hbm [shape: bf16[1024,128], index: 1, kind: input, shape index: {}]   ;;  %s1445_s2 = inlined_call_operand.vmem [shape: f32[1,128], index: 2, kind: input, shape index: {}]   ;;  %s1446_s3 = inlined_call_operand.hbm [shape: bf16[128,128], index: 3, kind: input, shape index: {}]   ;;  %s1447_s4 = inlined_call_operand.vmem [shape: f32[1,128], index: 4, kind: input, shape index: {}]   ;;  %s1448_s5 = inlined_call_operand.hbm [shape: bf16[16,128], index: 5, kind: output, shape index: {}]  }
   0x1   :  { %11 = vsyncpa [#allocation7], 0 }
   0x2   :  { %12 = vsyncpa [#allocation5], 0  ;;  %s1340_s18 = smov [#allocation6]   ;;  %s1246_s22 = scalar_lea.hbm %s1444_s1, 8192 }
   0x3   :  { %s30_s19 = sshll.u32 %s1340_s18, 4  ;;  %p1247_p0 = scmp.ne.s32.totalorder %s1444_s1, %s1246_s22  ;;  %s31_s19 = int_to_ptr.vmem [resolvable:$true] %s30_s19 }
   0x4   :  { %p1250_p1 = scmp.lt.u32.totalorder %s1246_s22, %s1444_s1 }
   0x6   :  { %p1252_p2 = pnand %p1250_p1, %p1247_p0 }
   0x8   :  { %1255 = shalt.err (!%p1252_p2)
}
   0x9   :  { %s1256_s27 = scalar_lea.vmem %s31_s19, 8192  ;;  %p1261_p4 = scmp.lt.s32.totalorder %s31_s19, %s31_s19 }
   0xa   :  { %p1257_p3 = scmp.ne.s32.totalorder %s31_s19, %s1256_s27  ;;  %p1262_p5 = scmp.lt.s32.totalorder %s1256_s27, %s1256_s27 }
   0xc   :  { %p1263_p6 = por %p1262_p5, %p1261_p4 }
   0xe   :  { %p1264_p7 = pnand %p1263_p6, %p1257_p3 }
  0x10   :  { %1267 = shalt.err (!%p1264_p7)
}
  0x11   :  { %s1341_s28 = smov 64   ;;  %s1342_s29 = smov 4  }
  0x12   :  { %36 = dma.hbm_to_vmem [thread:$0]  %s1444_s1, 8192, %s31_s19, [#allocation7], %s1341_s28, %s1341_s28, %s1342_s29  }
  0x13   :  { %s1343_s7 = smov [#allocation3]   ;;  %s1268_s11 = scalar_lea.hbm %s1443_s0, 1024 }
  0x14   :  { %s18_s8 = sshll.u32 %s1343_s7, 4  ;;  %p1269_p8 = scmp.ne.s32.totalorder %s1443_s0, %s1268_s11  ;;  %s19_s8 = int_to_ptr.vmem [resolvable:$true] %s18_s8 }
  0x15   :  { %p1272_p9 = scmp.lt.u32.totalorder %s1268_s11, %s1443_s0 }
  0x17   :  { %p1274_p10 = pnand %p1272_p9, %p1269_p8 }
  0x19   :  { %1277 = shalt.err (!%p1274_p10)
}
  0x1a   :  { %s1278_s16 = scalar_lea.vmem %s19_s8, 1024  ;;  %p1283_p12 = scmp.lt.s32.totalorder %s19_s8, %s19_s8 }
  0x1b   :  { %p1279_p11 = scmp.ne.s32.totalorder %s19_s8, %s1278_s16  ;;  %p1284_p13 = scmp.lt.s32.totalorder %s1278_s16, %s1278_s16 }
  0x1d   :  { %p1285_p0 = por %p1284_p13, %p1283_p12 }
  0x1f   :  { %p1286_p1 = pnand %p1285_p0, %p1279_p11 }
  0x21   :  { %1289 = shalt.err (!%p1286_p1)
}
  0x22   :  { %s1344_s1 = smov 512   ;;  %s1345_s17 = smov 32  }
  0x23   :  { %24 = dma.hbm_to_vmem [thread:$0]  %s1443_s0, 1024, %s19_s8, [#allocation4], %s1344_s1, %s1344_s1, %s1345_s17  }
  0x24   :  { %s1346_s20 = smov [#allocation8]   ;;  %s1290_s24 = scalar_lea.hbm %s1446_s3, 1024 }
  0x25   :  { %s44_s21 = sshll.u32 %s1346_s20, 4  ;;  %p1291_p2 = scmp.ne.s32.totalorder %s1446_s3, %s1290_s24  ;;  %s45_s21 = int_to_ptr.vmem [resolvable:$true] %s44_s21 }
  0x26   :  { %p1294_p3 = scmp.lt.u32.totalorder %s1290_s24, %s1446_s3 }
  0x28   :  { %p1296_p4 = pnand %p1294_p3, %p1291_p2 }
  0x2a   :  { %1299 = shalt.err (!%p1296_p4)
}
  0x2b   :  { %s1300_s6 = scalar_lea.vmem %s45_s21, 1024  ;;  %p1305_p6 = scmp.lt.s32.totalorder %s45_s21, %s45_s21 }
  0x2c   :  { %p1301_p5 = scmp.ne.s32.totalorder %s45_s21, %s1300_s6  ;;  %p1306_p7 = scmp.lt.s32.totalorder %s1300_s6, %s1300_s6 }
  0x2e   :  { %p1307_p8 = por %p1306_p7, %p1305_p6 }
  0x30   :  { %p1308_p9 = pnand %p1307_p8, %p1301_p5 }
  0x32   :  { %1311 = shalt.err (!%p1308_p9)
}
  0x33   :  { %50 = dma.hbm_to_vmem [thread:$0]  %s1446_s3, 1024, %s45_s21, [#allocation7], %s1341_s28, %s1341_s28, %s1342_s29  }
  0x34   :  { %1334 = dma.done.wait [#allocation4], 1024  }
  0x35   :  { %1335 = vsyncadd [#allocation4], 4294966272 }
  0x36   :  { %1336 = dma.done.wait [#allocation7], 9216  }
  0x37   :  { %1337 = vsyncadd [#allocation7], 4294958080  ;;  %v1174_v0 = vld [vmem:[#allocation6 + $0x40] sm:$0xff]   ;;  %v1178_v4 = vld [vmem:[#allocation6 + $0x48] sm:$0xff]   ;;  %vm1348_vm0 = vmmov 0   ;;  %s1349_s11 = smov [#allocation9]  }
  0x38   :  { %v1175_v1 = vld [vmem:[#allocation6 + $0xc0] sm:$0xff]   ;;  %1047 = vmatprep.subr.bf16.mxu0 %v1174_v0  ;;  %v1179_v5 = vld [vmem:[#allocation6 + $0xc8] sm:$0xff]   ;;  %v1182_v8 = vld [vmem:[#allocation6 + $0x50] sm:$0xff]   ;;  %s943_s12 = sshll.u32 %s1349_s11, 4  ;;  %s944_s12 = int_to_ptr.vmem [resolvable:$true] %s943_s12 }
  0x39   :  { %v1176_v2 = vld [vmem:[#allocation6] sm:$0xff]   ;;  %1069 = vmatprep.subr.bf16.mxu1 %v1175_v1  ;;  %v1180_v6 = vld [vmem:[#allocation6 + $0x8] sm:$0xff]   ;;  %v1183_v9 = vld [vmem:[#allocation6 + $0xd0] sm:$0xff]   ;;  %p1317_p11 = scmp.lt.s32.totalorder %s944_s12, %s944_s12 }
  0x3a   :  { %v1177_v3 = vld [vmem:[#allocation6 + $0x80] sm:$0xff]   ;;  %1048 = vmatpush3.bf16.msra.mxu0 %v1176_v2  ;;  %v1181_v7 = vld [vmem:[#allocation6 + $0x88] sm:$0xff]   ;;  %v1184_v10 = vld [vmem:[#allocation6 + $0x10] sm:$0xff]  }
  0x3b   :  { %1070 = vmatpush3.bf16.msra.mxu1 %v1177_v3  ;;  %1049 = vmatprep.subr.bf16.mxu0 %v1178_v4  ;;  %v1185_v11 = vld [vmem:[#allocation6 + $0x90] sm:$0xff]   ;;  %v1186_v12 = vld [vmem:[#allocation6 + $0x58] sm:$0xff]   ;;  %v1190_v16 = vld [vmem:[#allocation6 + $0x60] sm:$0xff]  }
  0x3c   :  { %1071 = vmatprep.subr.bf16.mxu1 %v1179_v5  ;;  %v1187_v13 = vld [vmem:[#allocation6 + $0xd8] sm:$0xff]   ;;  %v1191_v17 = vld [vmem:[#allocation6 + $0xe0] sm:$0xff]   ;;  %v1194_v20 = vld [vmem:[#allocation6 + $0x68] sm:$0xff]  }
  0x3d   :  { %v1188_v14 = vld [vmem:[#allocation6 + $0x18] sm:$0xff]   ;;  %v1192_v18 = vld [vmem:[#allocation6 + $0x20] sm:$0xff]   ;;  %v1195_v21 = vld [vmem:[#allocation6 + $0xe8] sm:$0xff]  }
  0x3e   :  { %1050 = vmatpush3.bf16.msra.mxu0 %v1180_v6  ;;  %v1189_v15 = vld [vmem:[#allocation6 + $0x98] sm:$0xff]   ;;  %v1193_v19 = vld [vmem:[#allocation6 + $0xa0] sm:$0xff]   ;;  %v1196_v22 = vld [vmem:[#allocation6 + $0x28] sm:$0xff]  }
  0x3f   :  { %1072 = vmatpush3.bf16.msra.mxu1 %v1181_v7  ;;  %1051 = vmatprep.subr.bf16.mxu0 %v1182_v8  ;;  %v1197_v23 = vld [vmem:[#allocation6 + $0xa8] sm:$0xff]   ;;  %v1198_v24 = vld [vmem:[#allocation6 + $0x70] sm:$0xff]   ;;  %v1202_v28 = vld [vmem:[#allocation6 + $0x78] sm:$0xff]  }
  0x40   :  { %1073 = vmatprep.subr.bf16.mxu1 %v1183_v9  ;;  %v1199_v25 = vld [vmem:[#allocation6 + $0xf0] sm:$0xff]   ;;  %v1203_v29 = vld [vmem:[#allocation6 + $0xf8] sm:$0xff]   ;;  %v69_v32 = vld [vmem:[#allocation3] sm:$0xff] }
  0x41   :  { %v1200_v26 = vld [vmem:[#allocation6 + $0x30] sm:$0xff]   ;;  %v1204_v30 = vld [vmem:[#allocation6 + $0x38] sm:$0xff]   ;;  %v73_v33 = vld [vmem:[#allocation3 + $0x20] sm:$0xff] }
  0x42   :  { %1052 = vmatpush3.bf16.msra.mxu0 %v1184_v10  ;;  %v1201_v27 = vld [vmem:[#allocation6 + $0xb0] sm:$0xff]   ;;  %v1205_v31 = vld [vmem:[#allocation6 + $0xb8] sm:$0xff]   ;;  %v70_v34 = vld [vmem:[#allocation3 + $0x8] sm:$0xff]  ;;  %v956_v35 = vcombine.low %v69_v32, %v73_v33  ;;  %v957_v36 = vcombine.high %v69_v32, %v73_v33 }
  0x43   :  { %1074 = vmatpush3.bf16.msra.mxu1 %v1185_v11  ;;  %1053 = vmatprep.subr.bf16.mxu0 %v1186_v12  ;;  %v74_v37 = vld [vmem:[#allocation3 + $0x28] sm:$0xff]  ;;  %v1206_v40 = vld [vmem:[#allocation6 + $0x140] sm:$0xff]   ;;  %v1214_v48 = vld [vmem:[#allocation6 + $0x150] sm:$0xff]  }
  0x44   :  { %1075 = vmatprep.subr.bf16.mxu1 %v1187_v13  ;;  %v958_v38 = vcombine.low %v70_v34, %v74_v37  ;;  %v959_v39 = vcombine.high %v70_v34, %v74_v37  ;;  %663 = vmatprep.mubr.bf16.mxu0 %v957_v36  ;;  %v1207_v41 = vld [vmem:[#allocation6 + $0x1c0] sm:$0xff]   ;;  %v1210_v44 = vld [vmem:[#allocation6 + $0x148] sm:$0xff]   ;;  %v1215_v49 = vld [vmem:[#allocation6 + $0x1d0] sm:$0xff]  }
  0x45   :  { %v1208_v42 = vld [vmem:[#allocation6 + $0x100] sm:$0xff]   ;;  %v1211_v45 = vld [vmem:[#allocation6 + $0x1c8] sm:$0xff]   ;;  %v1216_v50 = vld [vmem:[#allocation6 + $0x110] sm:$0xff]  }
  0x46   :  { %1054 = vmatpush3.bf16.msra.mxu0 %v1188_v14  ;;  %704 = vmatprep.mubr.bf16.mxu1 %v959_v39  ;;  %v1209_v43 = vld [vmem:[#allocation6 + $0x180] sm:$0xff]   ;;  %v1212_v46 = vld [vmem:[#allocation6 + $0x108] sm:$0xff]   ;;  %v1217_v51 = vld [vmem:[#allocation6 + $0x190] sm:$0xff]  }
  0x47   :  { %1076 = vmatpush3.bf16.msra.mxu1 %v1189_v15  ;;  %1055 = vmatprep.subr.bf16.mxu0 %v1190_v16  ;;  %v1213_v47 = vld [vmem:[#allocation6 + $0x188] sm:$0xff]   ;;  %v1218_v52 = vld [vmem:[#allocation6 + $0x158] sm:$0xff]   ;;  %v1222_v56 = vld [vmem:[#allocation6 + $0x160] sm:$0xff]  }
  0x48   :  { %1077 = vmatprep.subr.bf16.mxu1 %v1191_v17  ;;  %v1219_v53 = vld [vmem:[#allocation6 + $0x1d8] sm:$0xff]   ;;  %v1223_v57 = vld [vmem:[#allocation6 + $0x1e0] sm:$0xff]   ;;  %v1226_v60 = vld [vmem:[#allocation6 + $0x168] sm:$0xff]   ;;  %v1347_v17 = vmov 0.0  }
  0x49   :  { %v1220_v54 = vld [vmem:[#allocation6 + $0x118] sm:$0xff]   ;;  %v1224_v58 = vld [vmem:[#allocation6 + $0x120] sm:$0xff]   ;;  %v1227_v61 = vld [vmem:[#allocation6 + $0x1e8] sm:$0xff]  }
  0x4a   :  { %1056 = vmatpush3.bf16.msra.mxu0 %v1192_v18  ;;  %v1221_v55 = vld [vmem:[#allocation6 + $0x198] sm:$0xff]   ;;  %v1225_v59 = vld [vmem:[#allocation6 + $0x1a0] sm:$0xff]   ;;  %v1228_v62 = vld [vmem:[#allocation6 + $0x128] sm:$0xff]  }
  0x4b   :  { %1078 = vmatpush3.bf16.msra.mxu1 %v1193_v19  ;;  %1057 = vmatprep.subr.bf16.mxu0 %v1194_v20  ;;  %v1229_v63 = vld [vmem:[#allocation6 + $0x1a8] sm:$0xff]   ;;  %v1230_v0 = vld [vmem:[#allocation6 + $0x170] sm:$0xff]   ;;  %v1234_v4 = vld [vmem:[#allocation6 + $0x178] sm:$0xff]  }
  0x4c   :  { %1079 = vmatprep.subr.bf16.mxu1 %v1195_v21  ;;  %v1231_v1 = vld [vmem:[#allocation6 + $0x1f0] sm:$0xff]   ;;  %v1235_v5 = vld [vmem:[#allocation6 + $0x1f8] sm:$0xff]   ;;  %v1238_v16 = vld [vmem:[#allocation8] sm:$0xff]  }
  0x4d   :  { %v1232_v2 = vld [vmem:[#allocation6 + $0x130] sm:$0xff]   ;;  %v1236_v6 = vld [vmem:[#allocation6 + $0x138] sm:$0xff]   ;;  %v1239_v18 = vld [vmem:[#allocation8 + $0x8] sm:$0xff]  }
  0x4e   :  { %1058 = vmatpush3.bf16.msra.mxu0 %v1196_v22  ;;  %v1233_v3 = vld [vmem:[#allocation6 + $0x1b0] sm:$0xff]   ;;  %v1237_v7 = vld [vmem:[#allocation6 + $0x1b8] sm:$0xff]   ;;  %v1242_v21 = vld [vmem:[#allocation8 + $0x20] sm:$0xff]  }
  0x4f   :  { %1080 = vmatpush3.bf16.msra.mxu1 %v1197_v23  ;;  %1059 = vmatprep.subr.bf16.mxu0 %v1198_v24  ;;  %v71_v8 = vld [vmem:[#allocation3 + $0x10] sm:$0xff]  ;;  %v72_v12 = vld [vmem:[#allocation3 + $0x18] sm:$0xff]  ;;  %v1243_v22 = vld [vmem:[#allocation8 + $0x28] sm:$0xff]  }
  0x50   :  { %1081 = vmatprep.subr.bf16.mxu1 %v1199_v25  ;;  %v75_v9 = vld [vmem:[#allocation3 + $0x30] sm:$0xff]  ;;  %v76_v13 = vld [vmem:[#allocation3 + $0x38] sm:$0xff] }
  0x51   :  { %v960_v10 = vcombine.low %v71_v8, %v75_v9  ;;  %v961_v11 = vcombine.high %v71_v8, %v75_v9  ;;  %v962_v14 = vcombine.low %v72_v12, %v76_v13  ;;  %v963_v15 = vcombine.high %v72_v12, %v76_v13  ;;  %v1240_v19 = vld [vmem:[#allocation8 + $0x10] sm:$0xff]   ;;  %v1241_v20 = vld [vmem:[#allocation8 + $0x18] sm:$0xff]  }
  0x52   :  { %1060 = vmatpush3.bf16.msra.mxu0 %v1200_v26  ;;  %v1244_v23 = vld [vmem:[#allocation8 + $0x30] sm:$0xff]   ;;  %v1245_v24 = vld [vmem:[#allocation8 + $0x38] sm:$0xff]  }
  0x53   :  { %1082 = vmatpush3.bf16.msra.mxu1 %v1201_v27  ;;  %1061 = vmatprep.subr.bf16.mxu0 %v1202_v28 }
  0x54   :  { %1083 = vmatprep.subr.bf16.mxu1 %v1203_v29 }
  0x56   :  { %1062 = vmatpush3.bf16.msra.mxu0 %v1204_v30 }
  0x57   :  { %1084 = vmatpush3.bf16.msra.mxu1 %v1205_v31  ;;  %1091 = vmatprep.subr.bf16.mxu0 %v1206_v40 }
  0x58   :  { %1113 = vmatprep.subr.bf16.mxu1 %v1207_v41 }
  0x59   :  { %664 = vmatmul.mubr.bf16.vlgmr.msra.gmra.mrb[0].mxu0 %v956_v35 }
  0x5a   :  { %705 = vmatmul.mubr.bf16.vlgmr.msra.gmra.mrb[0].mxu1 %v958_v38  ;;  %1092 = vmatpush3.bf16.msra.mxu0 %v1208_v42 }
  0x5b   :  { %1114 = vmatpush3.bf16.msra.mxu1 %v1209_v43  ;;  %1093 = vmatprep.subr.bf16.mxu0 %v1210_v44 }
  0x5c   :  { %1115 = vmatprep.subr.bf16.mxu1 %v1211_v45  ;;  %745 = vmatprep.mubr.bf16.mxu0 %v961_v11 }
  0x5d   :  { %786 = vmatprep.mubr.bf16.mxu1 %v963_v15 }
  0x5e   :  { %1094 = vmatpush3.bf16.msra.mxu0 %v1212_v46 }
  0x5f   :  { %1116 = vmatpush3.bf16.msra.mxu1 %v1213_v47  ;;  %1095 = vmatprep.subr.bf16.mxu0 %v1214_v48 }
  0x60   :  { %1117 = vmatprep.subr.bf16.mxu1 %v1215_v49 }
  0x62   :  { %1096 = vmatpush3.bf16.msra.mxu0 %v1216_v50 }
  0x63   :  { %1118 = vmatpush3.bf16.msra.mxu1 %v1217_v51  ;;  %1097 = vmatprep.subr.bf16.mxu0 %v1218_v52  ;;  %v1028_v51 = vld [vmem:[%s1445_s2] ss:$0 sm:$0xff]  ;;  %s1312_s2 = scalar_lea.vmem %s944_s12, 128 }
  0x64   :  { %1119 = vmatprep.subr.bf16.mxu1 %v1219_v53  ;;  %p1313_p10 = scmp.ne.s32.totalorder %s944_s12, %s1312_s2  ;;  %p1318_p12 = scmp.lt.s32.totalorder %s1312_s2, %s1312_s2 }
  0x66   :  { %1098 = vmatpush3.bf16.msra.mxu0 %v1220_v54  ;;  %p1319_p13 = por %p1318_p12, %p1317_p11 }
  0x67   :  { %1120 = vmatpush3.bf16.msra.mxu1 %v1221_v55  ;;  %1099 = vmatprep.subr.bf16.mxu0 %v1222_v56 }
  0x68   :  { %1121 = vmatprep.subr.bf16.mxu1 %v1223_v57  ;;  %p1320_p0 = pnand %p1319_p13, %p1313_p10 }
  0x6a   :  { %1100 = vmatpush3.bf16.msra.mxu0 %v1224_v58 }
  0x6b   :  { %1122 = vmatpush3.bf16.msra.mxu1 %v1225_v59  ;;  %1101 = vmatprep.subr.bf16.mxu0 %v1226_v60 }
  0x6c   :  { %1123 = vmatprep.subr.bf16.mxu1 %v1227_v61  ;;  %v1029_v61 = vld [vmem:[%s1447_s4] ss:$0 sm:$0xff] }
  0x6e   :  { %1102 = vmatpush3.bf16.msra.mxu0 %v1228_v62 }
  0x6f   :  { %1124 = vmatpush3.bf16.msra.mxu1 %v1229_v63  ;;  %1103 = vmatprep.subr.bf16.mxu0 %v1230_v0 }
  0x70   :  { %1125 = vmatprep.subr.bf16.mxu1 %v1231_v1 }
  0x72   :  { %1104 = vmatpush3.bf16.msra.mxu0 %v1232_v2 }
  0x73   :  { %1126 = vmatpush3.bf16.msra.mxu1 %v1233_v3  ;;  %1105 = vmatprep.subr.bf16.mxu0 %v1234_v4 }
  0x74   :  { %1127 = vmatprep.subr.bf16.mxu1 %v1235_v5 }
  0x76   :  { %1106 = vmatpush3.bf16.msra.mxu0 %v1236_v6 }
  0x77   :  { %1128 = vmatpush3.bf16.msra.mxu1 %v1237_v7  ;;  %1144 = vmatprep.subr.bf16.mxu0 %v1347_v17 }
  0x79   :  { %746 = vmatmul.mubr.bf16.vlgmr.msra.gmra.mrb[4].mxu0 %v960_v10 }
  0x7a   :  { %787 = vmatmul.mubr.bf16.vlgmr.msra.gmra.mrb[4].mxu1 %v962_v14  ;;  %1145 = vmatpush3.bf16.msra.mxu0 %v1238_v16 }
  0x7b   :  { %1146 = vmatprep.subr.bf16.mxu0 %v1347_v17  ;;  %1160 = vmatprep.mubr.msk.bf16.mxu0 %vm1348_vm0, %v1347_v17 }
  0x7e   :  { %1147 = vmatpush3.bf16.msra.mxu0 %v1239_v18 }
  0x7f   :  { %1148 = vmatprep.subr.bf16.mxu0 %v1347_v17 }
  0x82   :  { %1149 = vmatpush3.bf16.msra.mxu0 %v1240_v19 }
  0x83   :  { %1150 = vmatprep.subr.bf16.mxu0 %v1347_v17 }
  0x86   :  { %1151 = vmatpush3.bf16.msra.mxu0 %v1241_v20 }
  0x87   :  { %1152 = vmatprep.subr.bf16.mxu0 %v1347_v17 }
  0x8a   :  { %1153 = vmatpush3.bf16.msra.mxu0 %v1242_v21 }
  0x8b   :  { %1154 = vmatprep.subr.bf16.mxu0 %v1347_v17 }
  0x8e   :  { %1155 = vmatpush3.bf16.msra.mxu0 %v1243_v22 }
  0x8f   :  { %1156 = vmatprep.subr.bf16.mxu0 %v1347_v17 }
  0x92   :  { %1157 = vmatpush3.bf16.msra.mxu0 %v1244_v23 }
  0x93   :  { %1158 = vmatprep.subr.bf16.mxu0 %v1347_v17 }
  0x96   :  { %1159 = vmatpush3.bf16.msra.mxu0 %v1245_v24 }
 0x12c   :  { %v1063_v25 = vpop.f32.mrb[0].mxu0 }
 0x12d   :  { %v1085_v26 = vpop.f32.mrb[0].mxu1  ;;  %v1064_v27 = vpop.f32.mrb[1].mxu0 }
 0x12e   :  { %v1065_v28 = vadd.f32 %v1064_v27, %v1063_v25  ;;  %v1086_v29 = vpop.f32.mrb[1].mxu1  ;;  %v1066_v30 = vpop.f32.mrb[2].mxu0 }
 0x12f   :  { %v1087_v31 = vadd.f32 %v1086_v29, %v1085_v26  ;;  %v1088_v32 = vpop.f32.mrb[2].mxu1  ;;  %v1067_v33 = vpop.f32.mrb[3].mxu0 }
 0x130   :  { %v1068_v34 = vadd.f32 %v1067_v33, %v1066_v30  ;;  %v1089_v35 = vpop.f32.mrb[3].mxu1 }
 0x131   :  { %v707_v36 = vadd.f32 %v1087_v31, %v1065_v28  ;;  %v1090_v37 = vadd.f32 %v1089_v35, %v1088_v32 }
 0x133   :  { %v710_v38 = vadd.f32 %v1090_v37, %v1068_v34 }
 0x14c   :  { %v1107_v39 = vpop.f32.mrb[4].mxu0 }
 0x14d   :  { %v1129_v40 = vpop.f32.mrb[4].mxu1  ;;  %v1108_v41 = vpop.f32.mrb[5].mxu0 }
 0x14e   :  { %v1109_v42 = vadd.f32 %v1108_v41, %v1107_v39  ;;  %v1130_v43 = vpop.f32.mrb[5].mxu1  ;;  %v1110_v44 = vpop.f32.mrb[6].mxu0 }
 0x14f   :  { %v1131_v45 = vadd.f32 %v1130_v43, %v1129_v40  ;;  %v1132_v46 = vpop.f32.mrb[6].mxu1  ;;  %v1111_v47 = vpop.f32.mrb[7].mxu0 }
 0x150   :  { %v748_v48 = vadd.f32 %v1109_v42, %v707_v36  ;;  %v1112_v49 = vadd.f32 %v1111_v47, %v1110_v44  ;;  %v1133_v50 = vpop.f32.mrb[7].mxu1 }
 0x151   :  { %v1134_v52 = vadd.f32 %v1133_v50, %v1132_v46 }
 0x152   :  { %v789_v53 = vadd.f32 %v1131_v45, %v748_v48  ;;  %v751_v54 = vadd.f32 %v1112_v49, %v710_v38 }
 0x154   :  { %v811_v55 = vadd.f32 %v1028_v51, %v789_v53  ;;  %v792_v56 = vadd.f32 %v1134_v52, %v751_v54 }
 0x156   :  { %v812_v57 = vadd.f32 %v1028_v51, %v792_v56  ;;  %v813_v58 = vmax.f32 %v811_v55, 0.0 }
 0x158   :  { %v814_v59 = vmax.f32 %v812_v57, 0.0 }
 0x15a   :  { %v815_v60 = vpack.c.bf16 %v814_v59, %v813_v58 }
 0x15c   :  { %1161 = vmatmul.mubr.bf16.vlgmr.msra.gmra.mrb[8].mxu0 %v815_v60 }
 0x22f   :  { %v921_v62 = vpop.f32.mrb[8].mxu0 }
 0x230   :  { %v1162_v63 = vpop.f32.mrb[9].mxu0  ;;  %v922_v1 = vadd.f32 %v1029_v61, %v921_v62 }
 0x231   :  { %v924_v0 = vpop.f32.mrb[10].mxu0 }
 0x232   :  { %v925_v2 = vadd.f32 %v1029_v61, %v924_v0  ;;  %v1163_v3 = vpop.f32.mrb[11].mxu0 }
 0x234   :  { %v1045_v4 = vpack.c.bf16 %v925_v2, %v922_v1 }
 0x236   :  { %1046 = vst [vmem:[#allocation9] sm:$0xff] %v1045_v4  }
 0x237   :  { %1323 = shalt.err (!%p1320_p0)
}
 0x238   :  { %s1324_s14 = scalar_lea.hbm %s1448_s5, 128 }
 0x239   :  { %p1325_p1 = scmp.ne.s32.totalorder %s1448_s5, %s1324_s14  ;;  %p1328_p2 = scmp.lt.u32.totalorder %s1324_s14, %s1448_s5 }
 0x23b   :  { %p1330_p3 = pnand %p1328_p2, %p1325_p1 }
 0x23d   :  { %1333 = shalt.err (!%p1330_p3)
}
 0x23e   :  { %949 = dma.vmem_to_hbm [thread:$0]  %s944_s12, 128, %s1448_s5, [#allocation5], %s1341_s28, %s1341_s28, %s1342_s29  }
 0x23f   :  { %1338 = dma.done.wait [#allocation5], 128  }
 0x240   :  { %1339 = vsyncadd [#allocation5], 4294967168 }
 0x241   :  { %953 = vsyncpa [#allocation4], 1 }
 0x242   :  { %954 = vsyncpa [#allocation7], 1 }
 0x243   :  { %955 = vsyncpa [#allocation5], 1 }

</bundles_post_ra>
